<compile_context>
chip_gen: v5e
topology: v5e:2x2
jax: 0.10.0
libtpu: 0.0.40
codegen_flags: <defaults>
</compile_context>

<pallas_src>
import functools

import jax
import jax.numpy as jnp
from jax.experimental import pallas as pl
from jax.experimental.pallas import tpu as pltpu

BN_EPS = 1e-5
LN_EPS = 1e-5


def _pick_tile_t(T, cap=512):
    """Largest time tile <= cap that divides T and is a multiple of 8 (else full T)."""
    if T <= cap:
        return T
    for cand in range(cap - cap % 8, 7, -8):
        if T % cand == 0:
            return cand
    return T  # no nice divisor -> single tile over the full length


def _conv_block_kernel(x_ref, halo_ref, w_ref, cb_ref, bns_ref, bnb_ref,
                       lng_ref, lnb_ref, *rest, kernel_size, pad, align, has_mask):
    # x_ref:   (1, TILE_T, C_in)        main input tile (f32)
    # halo_ref:(1, 1, 2*pad, C_in)      left halo rows [0:pad], right halo rows [pad:2*pad]
    #                                   (already zero at sequence boundaries)
    # w_ref:   (K, C_in, C_out)         conv weight, tap-major, bf16
    # cb/bns/bnb/lng/lnb: (1, C_out)    conv bias, folded BN scale/shift, LN gamma/beta
    # rest:    [keep_ref] o_ref win_ref
    if has_mask:
        keep_ref, o_ref, win_ref = rest
    else:
        o_ref, win_ref = rest
        keep_ref = None

    TILE_T = o_ref.shape[1]
    C_out = o_ref.shape[2]
    K = kernel_size

    # ---- assemble the haloed window in VMEM scratch (f32) ----
    # scratch layout: [.., left halo ends at `align`, main tile at [align, align+TILE_T),
    #                  right halo at [align+TILE_T, align+TILE_T+pad), ..]
    # `align` is a multiple of 8 so the big main-tile store is sublane-aligned.
    win_ref[align:align + TILE_T, :] = x_ref[0]
    if pad > 0:
        win_ref[align - pad:align, :] = halo_ref[0, 0, 0:pad, :]
        win_ref[align + TILE_T:align + TILE_T + pad, :] = halo_ref[0, 0, pad:2 * pad, :]

    # ---- "same" 1D conv as K tap matmuls on the MXU (bf16 in, f32 accumulate) ----
    acc = jnp.zeros((TILE_T, C_out), jnp.float32)
    for j in range(K):  # K is a static Python int
        off = align - pad + j
        xj = win_ref[off:off + TILE_T, :].astype(jnp.bfloat16)
        acc = acc + jnp.dot(xj, w_ref[j], preferred_element_type=jnp.float32)

    y = acc + cb_ref[...]                       # conv bias, broadcast over time

    # ---- BatchNorm1d (eval: folded per-channel scale/shift), then ReLU ----
    y = y * bns_ref[...] + bnb_ref[...]
    y = jnp.maximum(y, 0.0)

    # (dropout == identity in eval mode)

    # ---- LayerNorm over channel (last) dim — single-pass statistics ----
    inv_c = 1.0 / C_out
    mean = jnp.sum(y, axis=-1, keepdims=True) * inv_c
    ex2 = jnp.sum(y * y, axis=-1, keepdims=True) * inv_c
    var = jnp.maximum(ex2 - mean * mean, 0.0)
    y = (y - mean) * jax.lax.rsqrt(var + LN_EPS)
    y = y * lng_ref[...] + lnb_ref[...]

    # ---- optional mask (masked_fill(mask, 0) == multiply by keep) ----
    if has_mask:
        y = y * keep_ref[0]

    o_ref[0] = y.astype(o_ref.dtype)


@functools.partial(jax.jit, static_argnames=("kernel_size", "tile_t", "out_dtype"))
def conv_block_forward(enc_input, params, kernel_size, mask=None,
                       tile_t=None, out_dtype=jnp.float32):
    """enc_input: (B, T, C_in) float32.  Returns (B, T, C_out) in out_dtype."""
    B, T, C_in = enc_input.shape
    K = kernel_size
    assert K % 2 == 1, "ConvBlock 'same' conv requires odd kernel_size"
    pad = (K - 1) // 2
    C_out = params["conv_w"].shape[0]

    TILE_T = tile_t if tile_t is not None else _pick_tile_t(T)
    assert T % TILE_T == 0 and (TILE_T % 8 == 0 or TILE_T == T), "bad time tile"
    assert pad <= TILE_T
    nT = T // TILE_T
    align = ((pad + 7) // 8) * 8 if pad > 0 else 0

    x = enc_input.astype(jnp.float32)

    # Parameter folding / layout prep (cheap plain-JAX glue).
    # conv_w: (C_out, C_in, K) -> (K, C_in, C_out), bf16 for the MXU.
    w = jnp.transpose(params["conv_w"], (2, 1, 0)).astype(jnp.bfloat16)
    conv_b = params["conv_b"].reshape(1, C_out).astype(jnp.float32)
    bn_scale = (params["bn_gamma"] /
                jnp.sqrt(params["bn_running_var"] + BN_EPS)).reshape(1, C_out)
    bn_scale = bn_scale.astype(jnp.float32)
    bn_shift = (params["bn_beta"] -
                params["bn_running_mean"] * bn_scale[0]).reshape(1, C_out)
    bn_shift = bn_shift.astype(jnp.float32)
    ln_g = params["ln_gamma"].reshape(1, C_out).astype(jnp.float32)
    ln_b = params["ln_beta"].reshape(1, C_out).astype(jnp.float32)

    # Per-tile halo rows (2*pad rows per tile) instead of a full jnp.pad HBM round trip.
    if pad > 0:
        xr = x.reshape(B, nT, TILE_T, C_in)
        zrow = jnp.zeros((B, 1, pad, C_in), jnp.float32)
        left = jnp.concatenate([zrow, xr[:, :-1, TILE_T - pad:, :]], axis=1)
        right = jnp.concatenate([xr[:, 1:, :pad, :], zrow], axis=1)
        halo = jnp.concatenate([left, right], axis=2)      # (B, nT, 2*pad, C_in)
    else:
        halo = jnp.zeros((B, nT, 1, C_in), jnp.float32)    # dummy, never read

    has_mask = mask is not None
    kernel = functools.partial(_conv_block_kernel, kernel_size=K, pad=pad,
                               align=align, has_mask=has_mask)

    in_specs = [
        pl.BlockSpec((1, TILE_T, C_in), lambda b, t: (b, t, 0)),                 # x tile
        pl.BlockSpec((1, 1, halo.shape[2], C_in), lambda b, t: (b, t, 0, 0)),    # halo
        pl.BlockSpec((K, C_in, C_out), lambda b, t: (0, 0, 0)),                  # conv w
        pl.BlockSpec((1, C_out), lambda b, t: (0, 0)),                           # conv bias
        pl.BlockSpec((1, C_out), lambda b, t: (0, 0)),                           # bn scale
        pl.BlockSpec((1, C_out), lambda b, t: (0, 0)),                           # bn shift
        pl.BlockSpec((1, C_out), lambda b, t: (0, 0)),                           # ln gamma
        pl.BlockSpec((1, C_out), lambda b, t: (0, 0)),                           # ln beta
    ]
    args = [x, halo, w, conv_b, bn_scale, bn_shift, ln_g, ln_b]
    if has_mask:
        # TODO(synk): a lane-dense (B, T) mask (or per-batch length via scalar prefetch)
        # would avoid the last-dim-1 block; its DMA is tiny relative to x / out though.
        keep = (1.0 - mask.astype(jnp.float32)).reshape(B, T, 1)
        in_specs.append(pl.BlockSpec((1, TILE_T, 1), lambda b, t: (b, t, 0)))
        args.append(keep)

    out = pl.pallas_call(
        kernel,
        out_shape=jax.ShapeDtypeStruct((B, T, C_out), out_dtype),
        grid_spec=pltpu.PrefetchScalarGridSpec(
            num_scalar_prefetch=0,
            grid=(B, nT),
            in_specs=in_specs,
            out_specs=pl.BlockSpec((1, TILE_T, C_out), lambda b, t: (b, t, 0)),
            scratch_shapes=[pltpu.VMEM((TILE_T + 2 * align, C_in), jnp.float32)],
        ),
        compiler_params=pltpu.CompilerParams(
            # Both grid axes are independent -> let megacore (v7x 2 TCs) shard them.
            dimension_semantics=("parallel", "parallel"),
            # Explicit scoped-VMEM budget with headroom under v7x's 64 MiB physical.
            vmem_limit_bytes=48 * 1024 * 1024,
        ),
    )(*args)
    return out


def conv_block_reference(x, params, kernel_size, mask=None):
    """Pure-JAX reference (eval mode). Conv taps run in bf16 (f32 accumulation) to
    mirror the kernel's MXU numerics; a pure-f32 reference needs a looser tolerance."""
    K = kernel_size
    pad = (K - 1) // 2
    B, T, C_in = x.shape
    w = jnp.transpose(params["conv_w"], (2, 1, 0)).astype(jnp.bfloat16)  # (K,Cin,Cout)
    xp = jnp.pad(x, ((0, 0), (pad, pad), (0, 0)))
    y = sum(jnp.einsum("btc,co->bto", xp[:, j:j + T, :].astype(jnp.bfloat16), w[j],
                       preferred_element_type=jnp.float32) for j in range(K))
    y = y + params["conv_b"]
    scale = params["bn_gamma"] / jnp.sqrt(params["bn_running_var"] + BN_EPS)
    y = (y - params["bn_running_mean"]) * scale + params["bn_beta"]
    y = jnp.maximum(y, 0.0)
    mean = jnp.mean(y, axis=-1, keepdims=True)
    var = jnp.mean((y - mean) ** 2, axis=-1, keepdims=True)
    y = (y - mean) * jax.lax.rsqrt(var + LN_EPS)
    y = y * params["ln_gamma"] + params["ln_beta"]
    if mask is not None:
        y = jnp.where(mask[..., None], 0.0, y)
    return y


def init_params(key, in_channels, out_channels, kernel_size):
    """Deterministic synthetic parameters (shapes match the PyTorch module)."""
    k_w, k_b, k_g, k_bb, k_lg, k_lb = jax.random.split(key, 6)
    return {
        "conv_w": 0.1 * jax.random.normal(
            k_w, (out_channels, in_channels, kernel_size), jnp.float32),
        "conv_b": 0.1 * jax.random.normal(k_b, (out_channels,), jnp.float32),
        "bn_gamma": 1.0 + 0.05 * jax.random.normal(k_g, (out_channels,), jnp.float32),
        "bn_beta": 0.05 * jax.random.normal(k_bb, (out_channels,), jnp.float32),
        "bn_running_mean": jnp.zeros((out_channels,), jnp.float32),
        "bn_running_var": jnp.ones((out_channels,), jnp.float32),
        "ln_gamma": 1.0 + 0.05 * jax.random.normal(k_lg, (out_channels,), jnp.float32),
        "ln_beta": 0.05 * jax.random.normal(k_lb, (out_channels,), jnp.float32),
    }


if __name__ == "__main__":
    B, T, C_in, C_out, K = 2, 64, 8, 16, 3
    key = jax.random.PRNGKey(0)
    k_x, k_p, k_m = jax.random.split(key, 3)

    x = jax.random.normal(k_x, (B, T, C_in), jnp.float32)   # enc_input (B, T, C_in)
    params = init_params(k_p, C_in, C_out, K)
    mask = jax.random.bernoulli(k_m, 0.25, (B, T))

    # 1) no mask, forced small time tile -> exercises the multi-tile halo path.
    out = jax.block_until_ready(conv_block_forward(x, params, kernel_size=K, tile_t=16))
    ref = conv_block_reference(x, params, K)
    assert out.shape == (B, T, C_out)
    assert jnp.allclose(out, ref, atol=2e-2, rtol=2e-2), \
        float(jnp.max(jnp.abs(out - ref)))

    # 2) with mask, auto tile (single tile over T).
    out_m = jax.block_until_ready(
        conv_block_forward(x, params, kernel_size=K, mask=mask))
    ref_m = conv_block_reference(x, params, K, mask=mask)
    assert jnp.allclose(out_m, ref_m, atol=2e-2, rtol=2e-2), \
        float(jnp.max(jnp.abs(out_m - ref_m)))

    print("KERNEL_OK")
</pallas_src>

<mosaic_0001>
module attributes {stable_mosaic.version = 11 : i64} {
  func.func @_conv_block_kernel(%arg0: i32, %arg1: i32, %arg2: memref<1x16x8xf32, #tpu.memory_space<vmem>>, %arg3: memref<1x1x2x8xf32, #tpu.memory_space<vmem>>, %arg4: memref<3x8x16xbf16, #tpu.memory_space<vmem>>, %arg5: memref<1x16xf32, #tpu.memory_space<vmem>>, %arg6: memref<1x16xf32, #tpu.memory_space<vmem>>, %arg7: memref<1x16xf32, #tpu.memory_space<vmem>>, %arg8: memref<1x16xf32, #tpu.memory_space<vmem>>, %arg9: memref<1x16xf32, #tpu.memory_space<vmem>>, %arg10: memref<1x16x16xf32, #tpu.memory_space<vmem>>, %arg11: memref<32x8xf32, #tpu.memory_space<vmem>>) attributes {dimension_semantics = [#tpu.dimension_semantics<parallel>, #tpu.dimension_semantics<parallel>], iteration_bounds = array<i64: 2, 4>, scalar_prefetch = 0 : i64, scratch_operands = 1 : i64, tpu.core_type = #tpu.core_type<tc>, window_params = [{transform_indices = @transform_0, window_bounds = array<i64: 1, 16, 8>}, {transform_indices = @transform_1, window_bounds = array<i64: 1, 1, 2, 8>}, {pipeline_mode = #tpu.pipeline_mode<synchronous>, transform_indices = @transform_2, window_bounds = array<i64: 3, 8, 16>}, {pipeline_mode = #tpu.pipeline_mode<synchronous>, transform_indices = @transform_3, window_bounds = array<i64: 1, 16>}, {pipeline_mode = #tpu.pipeline_mode<synchronous>, transform_indices = @transform_4, window_bounds = array<i64: 1, 16>}, {pipeline_mode = #tpu.pipeline_mode<synchronous>, transform_indices = @transform_5, window_bounds = array<i64: 1, 16>}, {pipeline_mode = #tpu.pipeline_mode<synchronous>, transform_indices = @transform_6, window_bounds = array<i64: 1, 16>}, {pipeline_mode = #tpu.pipeline_mode<synchronous>, transform_indices = @transform_7, window_bounds = array<i64: 1, 16>}, {transform_indices = @transform_8, window_bounds = array<i64: 1, 16, 16>}]} {
    %c0 = arith.constant 0 : index
    %c0_0 = arith.constant 0 : index
    %c0_1 = arith.constant 0 : index
    %0 = vector.load %arg2[%c0, %c0_0, %c0_1] : memref<1x16x8xf32, #tpu.memory_space<vmem>>, vector<1x16x8xf32>
    %1 = vector.shape_cast %0 : vector<1x16x8xf32> to vector<16x8xf32>
    %c8 = arith.constant 8 : index
    %c0_2 = arith.constant 0 : index
    %2 = vector.load %arg11[%c8, %c0_2] : memref<32x8xf32, #tpu.memory_space<vmem>>, vector<16x8xf32>
    tpu.vector_store %arg11[%c8, %c0_2], %1 {strides = array<i32>} : memref<32x8xf32, #tpu.memory_space<vmem>>, vector<16x8xf32>,
    %c0_3 = arith.constant 0 : index
    %c0_4 = arith.constant 0 : index
    %c0_5 = arith.constant 0 : index
    %c0_6 = arith.constant 0 : index
    %3 = vector.load %arg3[%c0_3, %c0_4, %c0_5, %c0_6] : memref<1x1x2x8xf32, #tpu.memory_space<vmem>>, vector<1x1x1x8xf32>
    %4 = vector.shape_cast %3 : vector<1x1x1x8xf32> to vector<1x8xf32>
    %c7 = arith.constant 7 : index
    %c0_7 = arith.constant 0 : index
    %5 = vector.load %arg11[%c7, %c0_7] : memref<32x8xf32, #tpu.memory_space<vmem>>, vector<1x8xf32>
    tpu.vector_store %arg11[%c7, %c0_7], %4 {strides = array<i32>} : memref<32x8xf32, #tpu.memory_space<vmem>>, vector<1x8xf32>,
    %c0_8 = arith.constant 0 : index
    %c0_9 = arith.constant 0 : index
    %c1 = arith.constant 1 : index
    %c0_10 = arith.constant 0 : index
    %6 = vector.load %arg3[%c0_8, %c0_9, %c1, %c0_10] : memref<1x1x2x8xf32, #tpu.memory_space<vmem>>, vector<1x1x1x8xf32>
    %7 = vector.shape_cast %6 : vector<1x1x1x8xf32> to vector<1x8xf32>
    %c24 = arith.constant 24 : index
    %c0_11 = arith.constant 0 : index
    %8 = vector.load %arg11[%c24, %c0_11] : memref<32x8xf32, #tpu.memory_space<vmem>>, vector<1x8xf32>
    tpu.vector_store %arg11[%c24, %c0_11], %7 {strides = array<i32>} : memref<32x8xf32, #tpu.memory_space<vmem>>, vector<1x8xf32>,
    %cst = arith.constant 0.000000e+00 : f32
    %9 = vector.broadcast %cst : f32 to vector<16x16xf32>
    %c7_12 = arith.constant 7 : index
    %c0_13 = arith.constant 0 : index
    %10 = vector.load %arg11[%c7_12, %c0_13] : memref<32x8xf32, #tpu.memory_space<vmem>>, vector<16x8xf32>
    %11 = arith.truncf %10 : vector<16x8xf32> to vector<16x8xbf16>
    %c0_14 = arith.constant 0 : index
    %c0_15 = arith.constant 0 : index
    %c0_16 = arith.constant 0 : index
    %12 = vector.load %arg4[%c0_14, %c0_15, %c0_16] : memref<3x8x16xbf16, #tpu.memory_space<vmem>>, vector<1x8x16xbf16>
    %13 = vector.shape_cast %12 : vector<1x8x16xbf16> to vector<8x16xbf16>
    %cst_17 = arith.constant dense<0.000000e+00> : vector<16x16xf32>
    %14 = tpu.matmul %11, %13, %cst_17 {dimension_numbers = #tpu.dot_dimension_numbers<[1], [0], [0], [1], [0, 0, 1, 1], [], []>} : vector<16x8xbf16>, vector<8x16xbf16>, vector<16x16xf32> -> vector<16x16xf32>
    %15 = arith.addf %9, %14 : vector<16x16xf32>
    %c8_18 = arith.constant 8 : index
    %c0_19 = arith.constant 0 : index
    %16 = vector.load %arg11[%c8_18, %c0_19] : memref<32x8xf32, #tpu.memory_space<vmem>>, vector<16x8xf32>
    %17 = arith.truncf %16 : vector<16x8xf32> to vector<16x8xbf16>
    %c1_20 = arith.constant 1 : index
    %c0_21 = arith.constant 0 : index
    %c0_22 = arith.constant 0 : index
    %18 = vector.load %arg4[%c1_20, %c0_21, %c0_22] : memref<3x8x16xbf16, #tpu.memory_space<vmem>>, vector<1x8x16xbf16>
    %19 = vector.shape_cast %18 : vector<1x8x16xbf16> to vector<8x16xbf16>
    %cst_23 = arith.constant dense<0.000000e+00> : vector<16x16xf32>
    %20 = tpu.matmul %17, %19, %cst_23 {dimension_numbers = #tpu.dot_dimension_numbers<[1], [0], [0], [1], [0, 0, 1, 1], [], []>} : vector<16x8xbf16>, vector<8x16xbf16>, vector<16x16xf32> -> vector<16x16xf32>
    %21 = arith.addf %15, %20 : vector<16x16xf32>
    %c9 = arith.constant 9 : index
    %c0_24 = arith.constant 0 : index
    %22 = vector.load %arg11[%c9, %c0_24] : memref<32x8xf32, #tpu.memory_space<vmem>>, vector<16x8xf32>
    %23 = arith.truncf %22 : vector<16x8xf32> to vector<16x8xbf16>
    %c2 = arith.constant 2 : index
    %c0_25 = arith.constant 0 : index
    %c0_26 = arith.constant 0 : index
    %24 = vector.load %arg4[%c2, %c0_25, %c0_26] : memref<3x8x16xbf16, #tpu.memory_space<vmem>>, vector<1x8x16xbf16>
    %25 = vector.shape_cast %24 : vector<1x8x16xbf16> to vector<8x16xbf16>
    %cst_27 = arith.constant dense<0.000000e+00> : vector<16x16xf32>
    %26 = tpu.matmul %23, %25, %cst_27 {dimension_numbers = #tpu.dot_dimension_numbers<[1], [0], [0], [1], [0, 0, 1, 1], [], []>} : vector<16x8xbf16>, vector<8x16xbf16>, vector<16x16xf32> -> vector<16x16xf32>
    %27 = arith.addf %21, %26 : vector<16x16xf32>
    %c0_28 = arith.constant 0 : index
    %c0_29 = arith.constant 0 : index
    %28 = vector.load %arg5[%c0_28, %c0_29] : memref<1x16xf32, #tpu.memory_space<vmem>>, vector<1x16xf32>
    %29 = vector.broadcast %28 : vector<1x16xf32> to vector<16x16xf32>
    %30 = arith.addf %27, %29 : vector<16x16xf32>
    %c0_30 = arith.constant 0 : index
    %c0_31 = arith.constant 0 : index
    %31 = vector.load %arg6[%c0_30, %c0_31] : memref<1x16xf32, #tpu.memory_space<vmem>>, vector<1x16xf32>
    %32 = vector.broadcast %31 : vector<1x16xf32> to vector<16x16xf32>
    %33 = arith.mulf %30, %32 : vector<16x16xf32>
    %c0_32 = arith.constant 0 : index
    %c0_33 = arith.constant 0 : index
    %34 = vector.load %arg7[%c0_32, %c0_33] : memref<1x16xf32, #tpu.memory_space<vmem>>, vector<1x16xf32>
    %35 = vector.broadcast %34 : vector<1x16xf32> to vector<16x16xf32>
    %36 = arith.addf %33, %35 : vector<16x16xf32>
    %cst_34 = arith.constant 0.000000e+00 : f32
    %37 = vector.broadcast %cst_34 : f32 to vector<16x16xf32>
    %38 = arith.maximumf %36, %37 : vector<16x16xf32>
    %cst_35 = arith.constant dense<0.000000e+00> : vector<16xf32>
    %39 = vector.multi_reduction <add>, %38, %cst_35 [1] : vector<16x16xf32> to vector<16xf32>
    %40 = vector.shape_cast %39 : vector<16xf32> to vector<16x1xf32>
    %cst_36 = arith.constant 6.250000e-02 : f32
    %41 = vector.broadcast %cst_36 : f32 to vector<16x1xf32>
    %42 = arith.mulf %40, %41 : vector<16x1xf32>
    %43 = arith.mulf %38, %38 : vector<16x16xf32>
    %cst_37 = arith.constant dense<0.000000e+00> : vector<16xf32>
    %44 = vector.multi_reduction <add>, %43, %cst_37 [1] : vector<16x16xf32> to vector<16xf32>
    %45 = vector.shape_cast %44 : vector<16xf32> to vector<16x1xf32>
    %cst_38 = arith.constant 6.250000e-02 : f32
    %46 = vector.broadcast %cst_38 : f32 to vector<16x1xf32>
    %47 = arith.mulf %45, %46 : vector<16x1xf32>
    %48 = arith.mulf %42, %42 : vector<16x1xf32>
    %49 = arith.subf %47, %48 : vector<16x1xf32>
    %cst_39 = arith.constant 0.000000e+00 : f32
    %50 = vector.broadcast %cst_39 : f32 to vector<16x1xf32>
    %51 = arith.maximumf %49, %50 : vector<16x1xf32>
    %52 = vector.broadcast %42 : vector<16x1xf32> to vector<16x16xf32>
    %53 = arith.subf %38, %52 : vector<16x16xf32>
    %cst_40 = arith.constant 9.99999974E-6 : f32
    %54 = vector.broadcast %cst_40 : f32 to vector<16x1xf32>
    %55 = arith.addf %51, %54 : vector<16x1xf32>
    %56 = math.rsqrt %55 : vector<16x1xf32>
    %57 = vector.broadcast %56 : vector<16x1xf32> to vector<16x16xf32>
    %58 = arith.mulf %53, %57 : vector<16x16xf32>
    %c0_41 = arith.constant 0 : index
    %c0_42 = arith.constant 0 : index
    %59 = vector.load %arg8[%c0_41, %c0_42] : memref<1x16xf32, #tpu.memory_space<vmem>>, vector<1x16xf32>
    %60 = vector.broadcast %59 : vector<1x16xf32> to vector<16x16xf32>
    %61 = arith.mulf %58, %60 : vector<16x16xf32>
    %c0_43 = arith.constant 0 : index
    %c0_44 = arith.constant 0 : index
    %62 = vector.load %arg9[%c0_43, %c0_44] : memref<1x16xf32, #tpu.memory_space<vmem>>, vector<1x16xf32>
    %63 = vector.broadcast %62 : vector<1x16xf32> to vector<16x16xf32>
    %64 = arith.addf %61, %63 : vector<16x16xf32>
    %c0_45 = arith.constant 0 : index
    %c0_46 = arith.constant 0 : index
    %c0_47 = arith.constant 0 : index
    %65 = vector.load %arg10[%c0_45, %c0_46, %c0_47] : memref<1x16x16xf32, #tpu.memory_space<vmem>>, vector<1x16x16xf32>
    %66 = vector.shape_cast %65 : vector<1x16x16xf32> to vector<16x16xf32>
    %67 = vector.shape_cast %64 : vector<16x16xf32> to vector<1x16x16xf32>
    tpu.vector_store %arg10[%c0_45, %c0_46, %c0_47], %67 {strides = array<i32>} : memref<1x16x16xf32, #tpu.memory_space<vmem>>, vector<1x16x16xf32>,
    return
  }
  func.func @transform_0(%arg0: i32, %arg1: i32) -> (i32, i32, i32) {
    %c0_i32 = arith.constant 0 : i32
    %c0_i32_0 = arith.constant 0 : i32
    return %arg0, %arg1, %c0_i32 : i32, i32, i32
  }
  func.func @transform_1(%arg0: i32, %arg1: i32) -> (i32, i32, i32, i32) {
    %c0_i32 = arith.constant 0 : i32
    %c0_i32_0 = arith.constant 0 : i32
    %c0_i32_1 = arith.constant 0 : i32
    return %arg0, %arg1, %c0_i32, %c0_i32_0 : i32, i32, i32, i32
  }
  func.func @transform_2(%arg0: i32, %arg1: i32) -> (i32, i32, i32) {
    %c0_i32 = arith.constant 0 : i32
    %c0_i32_0 = arith.constant 0 : i32
    %c0_i32_1 = arith.constant 0 : i32
    %c0_i32_2 = arith.constant 0 : i32
    return %c0_i32, %c0_i32_0, %c0_i32_1 : i32, i32, i32
  }
  func.func @transform_3(%arg0: i32, %arg1: i32) -> (i32, i32) {
    %c0_i32 = arith.constant 0 : i32
    %c0_i32_0 = arith.constant 0 : i32
    %c0_i32_1 = arith.constant 0 : i32
    return %c0_i32, %c0_i32_0 : i32, i32
  }
  func.func @transform_4(%arg0: i32, %arg1: i32) -> (i32, i32) {
    %c0_i32 = arith.constant 0 : i32
    %c0_i32_0 = arith.constant 0 : i32
    %c0_i32_1 = arith.constant 0 : i32
    return %c0_i32, %c0_i32_0 : i32, i32
  }
  func.func @transform_5(%arg0: i32, %arg1: i32) -> (i32, i32) {
    %c0_i32 = arith.constant 0 : i32
    %c0_i32_0 = arith.constant 0 : i32
    %c0_i32_1 = arith.constant 0 : i32
    return %c0_i32, %c0_i32_0 : i32, i32
  }
  func.func @transform_6(%arg0: i32, %arg1: i32) -> (i32, i32) {
    %c0_i32 = arith.constant 0 : i32
    %c0_i32_0 = arith.constant 0 : i32
    %c0_i32_1 = arith.constant 0 : i32
    return %c0_i32, %c0_i32_0 : i32, i32
  }
  func.func @transform_7(%arg0: i32, %arg1: i32) -> (i32, i32) {
    %c0_i32 = arith.constant 0 : i32
    %c0_i32_0 = arith.constant 0 : i32
    %c0_i32_1 = arith.constant 0 : i32
    return %c0_i32, %c0_i32_0 : i32, i32
  }
  func.func @transform_8(%arg0: i32, %arg1: i32) -> (i32, i32, i32) {
    %c0_i32 = arith.constant 0 : i32
    %c0_i32_0 = arith.constant 0 : i32
    return %arg0, %arg1, %c0_i32 : i32, i32, i32
  }
}

</mosaic_0001>

<bundles_post_ra>
// kernel: conv_block_forward.1
= control target key start
LH: loop header
LB: loop body
LE: loop exit
PB: predicated region body
PF: predicated region fallthrough
CT: control target
= control target key end

     0   :  { %s811_s27 = smov 0   ;;  %s813_s28 = smov 0   ;;  %s912_s0 = inlined_call_operand.vmem [shape: f32[2,64,8], index: 0, kind: input, shape index: {}]   ;;  %s913_s1 = inlined_call_operand.vmem [shape: f32[2,4,2,8], index: 1, kind: input, shape index: {}]   ;;  %s914_s2 = inlined_call_operand.vmem [shape: bf16[3,8,16], index: 2, kind: input, shape index: {}]   ;;  %s915_s3 = inlined_call_operand.vmem [shape: f32[1,16], index: 3, kind: input, shape index: {}]   ;;  %s916_s4 = inlined_call_operand.vmem [shape: f32[1,16], index: 4, kind: input, shape index: {}]   ;;  %s917_s5 = inlined_call_operand.vmem [shape: f32[1,16], index: 5, kind: input, shape index: {}]   ;;  %s918_s6 = inlined_call_operand.vmem [shape: f32[1,16], index: 6, kind: input, shape index: {}]   ;;  %s919_s7 = inlined_call_operand.vmem [shape: f32[1,16], index: 7, kind: input, shape index: {}]   ;;  %s920_s8 = inlined_call_operand.vmem [shape: f32[2,64,16], index: 8, kind: output, shape index: {}]  }
   0x1   :  { %s815_s29 = smov 0   ;;  %s817_s30 = smov 0  }
   0x2   :  { %s819_s9 = smov 0  }
   0x3 LB: > { %s27_s10 = sadd.s32 1, %s756_s29  ;;  %s30_s11 = sadd.s32 1, %s760_s30  ;;  %s764_s9 = sphi %s819_s9, %s18_s9   ;;  %s760_s30 = sphi %s817_s30, %s924_s30   ;;  %s756_s29 = sphi %s815_s29, %s923_s29   ;;  %s752_s28 = sphi %s813_s28, %s922_s28   ;;  %s748_s27 = sphi %s811_s27, %s921_s27  }
   0x4   : > { %p28_p0 = scmp.ge.s32.totalorder %s27_s10, 4  ;;  %p661_p1 = scmp.ge.s32.totalorder %s764_s9, 1 }
   0x5   : > { %p298_p2 = scmp.lt.s32.totalorder %s764_s9, 9 }
   0x6   : > { %s926_s10 = smov (%p28_p0, %s27_s10), 0  ;;  %s928_s11 = smov (!%p28_p0, %s30_s11), %s760_s30 }
   0x7   : > { %p299_p3 = pnand %p661_p1, %p298_p2  ;;  %p32_p4 = scmp.ge.s32.totalorder %s928_s11, 2 }
   0x8   : > { %s662_s16 = sshll.u32 (!%p299_p3), %s748_s27, 1  ;;  %p349_p5 = scmp.lt.s32.totalorder (!%p299_p3), %s752_s28, 1 }
   0x9   : > { %s930_s11 = smov (%p32_p4, %s928_s11), 0  ;;  %302 = sbr.rel (%p299_p3) target bundleno = 335 (0x14f), region = 52 }
   0xa   : > { %p351_p6 = scmp.lt.s32.totalorder (!%p299_p3), %s662_s16, 7  ;;  %p360_p7 = scmp.lt.s32.totalorder (!%p299_p3), %s748_s27, 3 }
   0xe   : > { %v670_v0 = vld [vmem:[%s914_s2 + $0x4] sm:$0xf]  ;;  %vm399_vm0 = vcmask 1043456   ;;  %v390_v1 = vld [vmem:[%s914_s2] sm:$0xf]  ;;  %s932_s28 = smov (!%p349_p5, %s752_s28), 1 }
   0xf   : > { %v401_v2 = vsel %vm399_vm0, %v670_v0, 0  ;;  %v421_v3 = vsel %vm399_vm0, %v390_v1, 0  ;;  %v673_v4 = vld [vmem:[%s914_s2 + $0x8] sm:$0xf]  ;;  %s934_s16 = smov (!%p351_p6, %s662_s16), 7  ;;  %s663_s19 = sshll.u32 %s932_s28, 3 }
  0x10   : > { %410 = vmatpush.bf16.msra.mxu0 %v401_v2  ;;  %430 = vmatpush.bf16.msra.mxu1 %v421_v3  ;;  %v446_v5 = vsel %vm399_vm0, %v673_v4, 0  ;;  %s854_s20 = sadd.s32 %s663_s19, %s934_s16  ;;  %vm379_vm1 = vcmask 64512   ;;  %s665_s25 = sshll.u32 %s932_s28, 2  ;;  %vm383_vm2 = vcmask 57344   ;;  %v717_v22 = vld [vmem:[%s915_s3] ss:$0 sm:$0xff] }
  0x11   : > { %455 = vmatpush.bf16.msra.mxu2 %v446_v5  ;;  %s664_s21 = sshll.u32 %s854_s20, 3  ;;  %s936_s27 = smov (!%p360_p7, %s748_s27), 3  ;;  %v718_v25 = vld [vmem:[%s916_s4] ss:$0 sm:$0xff]  ;;  %vm484_vm3 = vcmask 130048  }
  0x12   : > { %s356_s24 = scalar_lea.vmem %s912_s0, %s664_s21  ;;  %s363_s26 = sadd.s32 %s665_s25, %s936_s27  ;;  %v719_v27 = vld [vmem:[%s917_s5] ss:$0 sm:$0xff] }
  0x13   : > { %v377_v6 = vld [vmem:[%s356_s24] sm:$0xff]  ;;  %v378_v7 = vld [vmem:[%s356_s24 + $0x8] sm:$0xff]  ;;  %s666_s12 = sshll.u32 %s363_s26, 1  ;;  %s374_s13 = scalar_lea.vmem %s920_s8, %s664_s21 }
  0x14   : > { %380 = vst.msk [vmem:[#allocation2 + $0x8] sm:$0xff] %vm379_vm1, %v377_v6  ;;  %s365_s15 = scalar_lea.vmem %s913_s1, %s666_s12  ;;  %v720_v6 = vld [vmem:[%s918_s6] ss:$0 sm:$0xff] }
  0x15   : > { %381 = vst.msk [vmem:[#allocation2 + $0x10] sm:$0xff] %vm379_vm1, %v378_v7  ;;  %v382_v8 = vld [vmem:[%s365_s15] sm:$0x1]  ;;  %v385_v9 = vld [vmem:[%s365_s15 + $0x1] sm:$0x1] }
  0x16   : > { %384 = vst.msk [vmem:[#allocation2 + $0x7] sm:$0x1] %vm383_vm2, %v382_v8 }
  0x17   : > { %386 = vst.msk [vmem:[#allocation2 + $0x18] sm:$0x1] %vm383_vm2, %v385_v9  ;;  %v721_v9 = vld [vmem:[%s919_s7] ss:$0 sm:$0xff] }
  0x1b   : > { %v391_v10 = vld [vmem:[#allocation2 + $0x8] sm:$0xff] }
  0x1c   : > { %v392_v11 = vld [vmem:[#allocation2 + $0x10] sm:$0xff] }
  0x1d   : > { %v393_v12 = vpack.c.bf16 %v392_v11, %v391_v10  ;;  %v388_v13 = vld [vmem:[#allocation2 + $0xf] sm:$0xff]  ;;  %v387_v15 = vld [vmem:[#allocation2 + $0x7] sm:$0xff] }
  0x1e   : > { %v437_v14 = vld [vmem:[#allocation2 + $0x9] sm:$0xff]  ;;  %v389_v16 = vpack.c.bf16 %v388_v13, %v387_v15  ;;  %v438_v17 = vld [vmem:[#allocation2 + $0x11] sm:$0xff] }
  0x1f   : > { %671 = vmatmul.msk.bf16.vlgmr.msra.gmra.mxu0 %vm379_vm1, %v393_v12  ;;  %v439_v18 = vpack.c.bf16 %v438_v17, %v437_v14 }
  0x20   : > { %672 = vmatmul.msk.bf16.vlgmr.msra.gmra.mxu1 %vm379_vm1, %v389_v16 }
  0x21   : > { %674 = vmatmul.msk.bf16.vlgmr.msra.gmra.mxu2 %vm379_vm1, %v439_v18 }
  0x9c   : > { %v412_v19 = vpop.f32.mrf.mxu0 }
  0x9d   : > { %v432_v20 = vpop.f32.mrf.mxu1 }
  0x9e   : > { %v433_v21 = vadd.f32 %v432_v20, %v412_v19 }
  0xa4   : > { %v457_v23 = vpop.f32.mrf.mxu2  ;;  %v414_v28 = vpop.f32.mrf.mxu0 }
  0xa5   : > { %v462_v24 = vadd.f32 %v457_v23, %v433_v21  ;;  %v434_v29 = vpop.f32.mrf.mxu1 }
  0xa6   : > { %v435_v31 = vadd.f32 %v434_v29, %v414_v28 }
  0xa7   : > { %v468_v26 = vadd.f32 %v717_v22, %v462_v24 }
  0xa9   : > { %v474_v30 = vmul.f32 %v718_v25, %v468_v26 }
  0xab   : > { %v480_v32 = vadd.f32 %v719_v27, %v474_v30 }
  0xac   : > { %v459_v33 = vpop.f32.mrf.mxu2 }
  0xad   : > { %v463_v34 = vadd.f32 %v459_v33, %v435_v31  ;;  %v482_v35 = vmax.f32 %v480_v32, 0.0 }
  0xaf   : > { %v469_v36 = vadd.f32 %v717_v22, %v463_v34  ;;  %v485_v37 = vsel %vm484_vm3, %v482_v35, 0.0  ;;  %v493_v38 = vmul.f32 %v482_v35, %v482_v35 }
  0xb0   : > { %486 = vadd.xlane.f32.xlu0 %v485_v37 }
  0xb1   : > { %v475_v39 = vmul.f32 %v718_v25, %v469_v36  ;;  %v495_v40 = vsel %vm484_vm3, %v493_v38, 0.0 }
  0xb2   : > { %496 = vadd.xlane.f32.xlu1 %v495_v40 }
  0xb3   : > { %v481_v41 = vadd.f32 %v719_v27, %v475_v39 }
  0xb5   : > { %v483_v42 = vmax.f32 %v481_v41, 0.0 }
  0xb7   : > { %v488_v43 = vsel %vm484_vm3, %v483_v42, 0.0  ;;  %v494_v44 = vmul.f32 %v483_v42, %v483_v42 }
  0xb8   : > { %489 = vadd.xlane.f32.xlu0 %v488_v43 }
  0xb9   : > { %v498_v45 = vsel %vm484_vm3, %v494_v44, 0.0 }
  0xba   : > { %499 = vadd.xlane.f32.xlu1 %v498_v45 }
 0x123   : > { %v487_v46 = vpop.xlane.xlu0 %486 }
 0x124   : > { %v491_v47 = vmul.f32 0.0625, %v487_v46 }
 0x125   : > { %v497_v48 = vpop.xlane.xlu1 %496 }
 0x126   : > { %v503_v49 = vmul.f32 %v491_v47, %v491_v47  ;;  %v501_v50 = vmul.f32 0.0625, %v497_v48  ;;  %v509_v5 = vsub.f32 %v482_v35, %v491_v47 }
 0x128   : > { %v505_v51 = vsub.f32 %v501_v50, %v503_v49 }
 0x12a   : > { %v507_v52 = vmax.f32 %v505_v51, 0.0 }
 0x12b   : > { %v490_v53 = vpop.xlane.xlu0 %489 }
 0x12c   : > { %v511_v54 = vadd.f32 1e-05, %v507_v52  ;;  %v492_v55 = vmul.f32 0.0625, %v490_v53 }
 0x12d   : > { %v500_v56 = vpop.xlane.xlu1 %499 }
 0x12e   : > { %722 = vrsqrt.f32 %v511_v54  ;;  %v504_v57 = vmul.f32 %v492_v55, %v492_v55  ;;  %v502_v58 = vmul.f32 0.0625, %v500_v56  ;;  %vm519_vm5 = vweird.f32 %v511_v54 }
 0x12f   : > { %v510_v17 = vsub.f32 %v483_v42, %v492_v55 }
 0x130   : > { %v506_v59 = vsub.f32 %v502_v58, %v504_v57 }
 0x132   : > { %v508_v60 = vmax.f32 %v506_v59, 0.0 }
 0x134   : > { %v723_v61 = vpop.eup %722  ;;  %v512_v63 = vadd.f32 1e-05, %v508_v60 }
 0x135   : > { %v514_v62 = vmul.f32 %v723_v61, %v511_v54  ;;  %vm520_vm4 = vweird.f32 %v723_v61 }
 0x136   : > { %724 = vrsqrt.f32 %v512_v63  ;;  %vm521_vm6 = vmor %vm519_vm5, %vm520_vm4  ;;  %vm529_vm8 = vweird.f32 %v512_v63 }
 0x137   : > { %v515_v0 = vmul.f32 %v723_v61, %v514_v62 }
 0x139   : > { %v516_v1 = vmul.f32 0.5, %v515_v0 }
 0x13b   : > { %v517_v2 = vsub.f32 1.5, %v516_v1 }
 0x13c   : > { %v725_v3 = vpop.eup %724 }
 0x13d   : > { %v518_v4 = vmul.f32 %v723_v61, %v517_v2  ;;  %v524_v7 = vmul.f32 %v725_v3, %v512_v63  ;;  %vm530_vm7 = vweird.f32 %v725_v3 }
 0x13e   : > { %vm531_vm9 = vmor %vm529_vm8, %vm530_vm7 }
 0x13f   : > { %v522_v8 = vsel %vm521_vm6, %v723_v61, %v518_v4  ;;  %v525_v11 = vmul.f32 %v725_v3, %v524_v7 }
 0x140   : > { %v533_v10 = vmul.f32 %v522_v8, %v509_v5 }
 0x141   : > { %v526_v13 = vmul.f32 0.5, %v525_v11 }
 0x142   : > { %v539_v12 = vmul.f32 %v720_v6, %v533_v10 }
 0x143   : > { %v527_v15 = vsub.f32 1.5, %v526_v13 }
 0x144   : > { %v545_v14 = vadd.f32 %v721_v9, %v539_v12 }
 0x145   : > { %v528_v16 = vmul.f32 %v725_v3, %v527_v15 }
 0x146   : > { %547 = vst.msk [vmem:[%s374_s13] sm:$0xff] %vm484_vm3, %v545_v14 }
 0x147   : > { %v532_v18 = vsel %vm531_vm9, %v725_v3, %v528_v16 }
 0x148   : > { %v534_v19 = vmul.f32 %v532_v18, %v510_v17 }
 0x14a   : > { %v540_v20 = vmul.f32 %v720_v6, %v534_v19 }
 0x14c   : > { %v546_v21 = vadd.f32 %v721_v9, %v540_v20 }
 0x14e   : > { %548 = vst.msk [vmem:[%s374_s13 + $0x8] sm:$0xff] %vm484_vm3, %v546_v21 }
 0x14f PF: > { %s18_s9 = sadd.s32 1, %s764_s9   ;;  %s921_s27 = smov %s756_s29 }
 0x150   : > { %p15_p8 = scmp.ge.s32.totalorder %s18_s9, 10   ;;  %s922_s28 = smov %s760_s30 }
 0x151   : > { %s923_s29 = smov %s926_s10  ;;  %s924_s30 = smov %s930_s11 }
 0x152   :  { %17 = sbr.rel (!%p15_p8) target bundleno = 3 (0x3), region = 87 }

</bundles_post_ra>
